<compile_context>
chip_gen: v5e
topology: v5e:2x2
jax: 0.10.0
libtpu: 0.0.40
codegen_flags: <defaults>
</compile_context>

<pallas_src>
import jax
import jax.numpy as jnp
from jax.experimental import pallas as pl
from jax.experimental.pallas import tpu as pltpu


def _mlp_scheduler_kernel(packed_ref, wtab_ref, w1p_ref, out_ref):
    packed_i = packed_ref[...]                          # [T, 8] i32
    packed_f = pltpu.bitcast(packed_i, jnp.float32)     # reinterpret, no data move

    has = packed_f[:, 0:1]        # [T, 1] f32 (bitcast back from i32 container)
    layer = packed_i[:, 1:2]      # [T, 1] i32, values in [0, Vl)
    rank = packed_i[:, 2:3]       # [T, 1] i32, already shifted by +Vl in wrapper

    t = packed_i.shape[0]
    v_aug = wtab_ref.shape[0]     # Vl + Vr + 2
    has_col = v_aug - 2
    one_col = v_aug - 1

    # Fused affine one-hot activation: (layer one-hot | rank one-hot | has | 1).
    iota = jax.lax.broadcasted_iota(jnp.int32, (t, v_aug), 1)
    onehot = jnp.logical_or(iota == layer, iota == rank).astype(jnp.float32)
    act = jnp.where(iota == has_col, has, onehot)
    act = jnp.where(iota == one_col, 1.0, act)          # [T, V+2]

    # dense0 (embeddings + has-column + bias all folded into wtab) + ReLU:
    # ONE MXU matmul for the whole first layer.
    h = jnp.dot(act, wtab_ref[...], preferred_element_type=jnp.float32)   # [T, H]
    h = jnp.maximum(h, 0.0)

    # dense1, padded to 128 output lanes -> lane-dense (unmasked) stores.
    out_ref[...] = jnp.dot(h, w1p_ref[...], preferred_element_type=jnp.float32)


def prepare_params(params):
    """One-time fold of the MLPScheduler weights into kernel-ready tensors.

    Call once after loading/updating weights; `mlp_scheduler_forward` only
    touches the result, so no weight math runs per forward call.
    """
    ltab = params["layer_embeddings"].astype(jnp.float32)    # [Vl, E]
    rtab = params["rank_embeddings"].astype(jnp.float32)     # [Vr, E]
    vl, e = ltab.shape
    vr = rtab.shape[0]

    hp = jax.lax.Precision.HIGHEST
    w0_t = params["dense0_w"].astype(jnp.float32).T           # [2E+1, H]
    w0_has = w0_t[0:1]                                        # [1, H]
    w0_layer = w0_t[1:1 + e]                                  # [E, H]
    w0_rank = w0_t[1 + e:1 + 2 * e]                           # [E, H]
    b0 = params["dense0_b"].astype(jnp.float32).reshape(1, -1)

    # Stacked dense0 table over the augmented activation:
    #   rows [0, Vl)        : layer one-hot  -> ltab @ W0_layer
    #   rows [Vl, Vl+Vr)    : rank one-hot   -> rtab @ W0_rank
    #   row  Vl+Vr          : has column     -> W0_has
    #   row  Vl+Vr+1        : constant 1     -> b0
    wtab = jnp.concatenate(
        [jnp.dot(ltab, w0_layer, precision=hp),
         jnp.dot(rtab, w0_rank, precision=hp),
         w0_has, b0], axis=0)                                 # [Vl+Vr+2, H]

    out_w = 128                                               # lane-dense output
    w1_t = params["dense1_w"].astype(jnp.float32).T           # [H, 2]
    w1p = jnp.pad(w1_t, ((0, 0), (0, out_w - w1_t.shape[1]))) # [H, 128]

    return {
        "wtab": wtab,
        "w1p": w1p,
        "weight": jnp.asarray(params["weight"], jnp.float32),
        "vl": int(vl),
        "vr": int(vr),
    }


def mlp_scheduler_forward(prepared, has_answer_logits, layers, ranks, *, row_tile=1024):
    bsz, n_passages = has_answer_logits.shape
    n = bsz * n_passages

    # Adaptive tile: the whole (8-row-aligned) problem runs in a single grid
    # step when it fits (always true for valid inputs, N <= 4); otherwise in
    # `row_tile`-row steps on a "parallel" grid axis (megacore on v7x).
    n8 = 8 * pl.cdiv(n, 8)
    tile = min(row_tile, n8)
    tile = max(8, (tile // 8) * 8)
    n_pad = tile * pl.cdiv(n, tile)

    wtab = prepared["wtab"]
    w1p = prepared["w1p"]
    vl = prepared["vl"]
    v_aug, hidden = wtab.shape
    out_w = w1p.shape[1]

    # Single packed [n_pad, 8] i32 input: has (bitcast), layer, rank(+Vl), pad.
    has_bits = jax.lax.bitcast_convert_type(
        has_answer_logits.reshape(n, 1).astype(jnp.float32), jnp.int32)
    layer_col = layers.reshape(n, 1).astype(jnp.int32)
    rank_col = ranks.reshape(n, 1).astype(jnp.int32) + vl      # stacked-table coords
    packed = jnp.concatenate(
        [has_bits, layer_col, rank_col, jnp.zeros((n, 5), jnp.int32)], axis=1)
    packed = jnp.pad(packed, ((0, n_pad - n), (0, 0)))

    mlp_out = pl.pallas_call(
        _mlp_scheduler_kernel,
        out_shape=jax.ShapeDtypeStruct((n_pad, out_w), jnp.float32),
        grid_spec=pltpu.PrefetchScalarGridSpec(
            num_scalar_prefetch=0,
            grid=(n_pad // tile,),
            in_specs=[
                pl.BlockSpec((tile, 8), lambda i: (i, 0)),        # packed inputs
                pl.BlockSpec((v_aug, hidden), lambda i: (0, 0)),  # folded dense0 table
                pl.BlockSpec((hidden, out_w), lambda i: (0, 0)),  # dense1 (128-lane pad)
            ],
            out_specs=pl.BlockSpec((tile, out_w), lambda i: (i, 0)),
        ),
        compiler_params=pltpu.CompilerParams(
            dimension_semantics=("parallel",)),
    )(packed, wtab, w1p)

    offset_logit = mlp_out[:n, :2].reshape(bsz, n_passages, 2)

    # Faithful reproduction of the module's residual add:
    # torch.squeeze(mlp_output, -1) is a no-op (last dim == 2) and the broadcast
    # [bsz, n_passages] + [bsz, n_passages, 2] is only shape-valid for
    # n_passages == 2 (it mixes indices: out[i,j,k] = w*has[j,k] + off[i,j,k]).
    assert n_passages == 2, "MLPScheduler residual broadcast requires n_passages == 2"
    priorities = prepared["weight"] * has_answer_logits + offset_logit
    return priorities


def mlp_scheduler_forward_ref(params, has, layers, ranks):
    """Pure-JAX reference mirroring the PyTorch forward."""
    layer_emb = params["layer_embeddings"][layers]
    rank_emb = params["rank_embeddings"][ranks]
    x = jnp.concatenate([has[..., None], layer_emb, rank_emb], axis=-1)
    h = jax.nn.relu(x @ params["dense0_w"].T + params["dense0_b"])
    mlp_out = h @ params["dense1_w"].T
    offset = jnp.squeeze(mlp_out, -1) if mlp_out.shape[-1] == 1 else mlp_out
    return params["weight"] * has + offset


def init_params(key, *, n_context, num_layers, embed_size, hidden_size):
    """Deterministic synthetic parameters (shapes from MLPScheduler.__init__)."""
    k = jax.random.split(key, 5)
    in_features = 2 * embed_size + 1
    probs = jnp.array([0.5 / (i + 1) for i in range(n_context)], jnp.float32)
    bound0 = 1.0 / jnp.sqrt(jnp.float32(in_features))
    bound1 = 1.0 / jnp.sqrt(jnp.float32(hidden_size))
    return {
        # init_priorities = probs_to_logits(p, is_binary=True) = log(p/(1-p));
        # defined in BaseScheduler.__init__ but unused by forward().
        "init_priorities": jnp.log(probs) - jnp.log1p(-probs),
        "weight": jnp.float32(1.0),
        "layer_embeddings": jax.random.normal(k[0], (num_layers + 1, embed_size), jnp.float32),
        "rank_embeddings": jax.random.normal(k[1], (n_context, embed_size), jnp.float32),
        "dense0_w": jax.random.uniform(k[2], (hidden_size, in_features), jnp.float32,
                                       -bound0, bound0),
        "dense0_b": jax.random.uniform(k[3], (hidden_size,), jnp.float32,
                                       -bound0, bound0),
        "dense1_w": jax.random.uniform(k[4], (2, hidden_size), jnp.float32,
                                       -bound1, bound1),
    }


if __name__ == "__main__":
    cfg = dict(n_context=16, num_layers=12, embed_size=8, hidden_size=32)
    key = jax.random.PRNGKey(0)
    pkey, hkey, lkey, rkey = jax.random.split(key, 4)
    params = init_params(pkey, **cfg)
    prepared = prepare_params(params)   # one-time weight fold, hoisted out of forward

    # n_passages must be 2 for the module's residual broadcast to be valid
    # (has_answer_logits [bsz, n] broadcast against offset_logit [bsz, n, 2]).
    bsz, n_passages = 2, 2
    has = jax.random.normal(hkey, (bsz, n_passages), jnp.float32)
    layers = jax.random.randint(lkey, (bsz, n_passages), 0, cfg["num_layers"] + 1, jnp.int32)
    ranks = jax.random.randint(rkey, (bsz, n_passages), 0, cfg["n_context"], jnp.int32)

    fwd = jax.jit(lambda h, l, r: mlp_scheduler_forward(prepared, h, l, r))
    out = jax.block_until_ready(fwd(has, layers, ranks))

    ref = mlp_scheduler_forward_ref(params, has, layers, ranks)
    assert out.shape == ref.shape, (out.shape, ref.shape)
    # Default (single-pass bf16) MXU precision in-kernel -> a couple of bf16
    # ulps at O(1) magnitude; 2e-3 absolute is ~1 bf16 ulp there.
    assert jnp.allclose(out, ref, atol=2e-3, rtol=1e-3), float(jnp.max(jnp.abs(out - ref)))
    print("KERNEL_OK")
</pallas_src>

<mosaic_0001>
module attributes {stable_mosaic.version = 11 : i64} {
  func.func @_mlp_scheduler_kernel(%arg0: i32, %arg1: memref<8x8xi32, #tpu.memory_space<vmem>>, %arg2: memref<31x32xf32, #tpu.memory_space<vmem>>, %arg3: memref<32x128xf32, #tpu.memory_space<vmem>>, %arg4: memref<8x128xf32, #tpu.memory_space<vmem>>) attributes {dimension_semantics = [#tpu.dimension_semantics<parallel>], iteration_bounds = array<i64: 1>, scalar_prefetch = 0 : i64, scratch_operands = 0 : i64, tpu.core_type = #tpu.core_type<tc>, window_params = [{transform_indices = @transform_0, window_bounds = array<i64: 8, 8>}, {pipeline_mode = #tpu.pipeline_mode<synchronous>, transform_indices = @transform_1, window_bounds = array<i64: 31, 32>}, {pipeline_mode = #tpu.pipeline_mode<synchronous>, transform_indices = @transform_2, window_bounds = array<i64: 32, 128>}, {transform_indices = @transform_3, window_bounds = array<i64: 8, 128>}]} {
    %c0 = arith.constant 0 : index
    %c0_0 = arith.constant 0 : index
    %0 = vector.load %arg1[%c0, %c0_0] : memref<8x8xi32, #tpu.memory_space<vmem>>, vector<8x8xi32>
    %1 = tpu.bitcast %0 : vector<8x8xi32> -> vector<8x8xf32>
    %2 = vector.extract_strided_slice %1 {offsets = [0, 0], sizes = [8, 1], strides = [1, 1]} : vector<8x8xf32> to vector<8x1xf32>
    %3 = vector.extract_strided_slice %0 {offsets = [0, 1], sizes = [8, 1], strides = [1, 1]} : vector<8x8xi32> to vector<8x1xi32>
    %4 = vector.extract_strided_slice %0 {offsets = [0, 2], sizes = [8, 1], strides = [1, 1]} : vector<8x8xi32> to vector<8x1xi32>
    %5 = tpu.iota {dimensions = array<i32: 1>} : vector<8x31xi32>
    %6 = vector.broadcast %3 : vector<8x1xi32> to vector<8x31xi32>
    %7 = arith.cmpi eq, %5, %6 : vector<8x31xi32>
    %8 = vector.broadcast %4 : vector<8x1xi32> to vector<8x31xi32>
    %9 = arith.cmpi eq, %5, %8 : vector<8x31xi32>
    %10 = arith.ori %7, %9 : vector<8x31xi1>
    %11 = arith.extui %10 : vector<8x31xi1> to vector<8x31xi32>
    %12 = arith.sitofp %11 : vector<8x31xi32> to vector<8x31xf32>
    %c29_i32 = arith.constant 29 : i32
    %13 = vector.broadcast %c29_i32 : i32 to vector<8x31xi32>
    %14 = arith.cmpi eq, %5, %13 : vector<8x31xi32>
    %15 = vector.shape_cast %2 : vector<8x1xf32> to vector<8x1xf32>
    %16 = vector.broadcast %15 : vector<8x1xf32> to vector<8x31xf32>
    %17 = arith.select %14, %16, %12 : vector<8x31xi1>, vector<8x31xf32>
    %c30_i32 = arith.constant 30 : i32
    %18 = vector.broadcast %c30_i32 : i32 to vector<8x31xi32>
    %19 = arith.cmpi eq, %5, %18 : vector<8x31xi32>
    %cst = arith.constant 1.000000e+00 : f32
    %20 = vector.broadcast %cst : f32 to vector<8x31xf32>
    %21 = arith.select %19, %20, %17 : vector<8x31xi1>, vector<8x31xf32>
    %c0_1 = arith.constant 0 : index
    %c0_2 = arith.constant 0 : index
    %22 = vector.load %arg2[%c0_1, %c0_2] : memref<31x32xf32, #tpu.memory_space<vmem>>, vector<31x32xf32>
    %cst_3 = arith.constant dense<0.000000e+00> : vector<8x32xf32>
    %23 = tpu.matmul %21, %22, %cst_3 {dimension_numbers = #tpu.dot_dimension_numbers<[1], [0], [0], [1], [0, 0, 1, 1], [], []>} : vector<8x31xf32>, vector<31x32xf32>, vector<8x32xf32> -> vector<8x32xf32>
    %cst_4 = arith.constant 0.000000e+00 : f32
    %24 = vector.broadcast %cst_4 : f32 to vector<8x32xf32>
    %25 = arith.maximumf %23, %24 : vector<8x32xf32>
    %c0_5 = arith.constant 0 : index
    %c0_6 = arith.constant 0 : index
    %26 = vector.load %arg3[%c0_5, %c0_6] : memref<32x128xf32, #tpu.memory_space<vmem>>, vector<32x128xf32>
    %cst_7 = arith.constant dense<0.000000e+00> : vector<8x128xf32>
    %27 = tpu.matmul %25, %26, %cst_7 {dimension_numbers = #tpu.dot_dimension_numbers<[1], [0], [0], [1], [0, 0, 1, 1], [], []>} : vector<8x32xf32>, vector<32x128xf32>, vector<8x128xf32> -> vector<8x128xf32>
    %c0_8 = arith.constant 0 : index
    %c0_9 = arith.constant 0 : index
    %28 = vector.load %arg4[%c0_8, %c0_9] : memref<8x128xf32, #tpu.memory_space<vmem>>, vector<8x128xf32>
    tpu.vector_store %arg4[%c0_8, %c0_9], %27 {strides = array<i32>} : memref<8x128xf32, #tpu.memory_space<vmem>>, vector<8x128xf32>,
    return
  }
  func.func @transform_0(%arg0: i32) -> (i32, i32) {
    %c0_i32 = arith.constant 0 : i32
    %c0_i32_0 = arith.constant 0 : i32
    return %arg0, %c0_i32 : i32, i32
  }
  func.func @transform_1(%arg0: i32) -> (i32, i32) {
    %c0_i32 = arith.constant 0 : i32
    %c0_i32_0 = arith.constant 0 : i32
    %c0_i32_1 = arith.constant 0 : i32
    return %c0_i32, %c0_i32_0 : i32, i32
  }
  func.func @transform_2(%arg0: i32) -> (i32, i32) {
    %c0_i32 = arith.constant 0 : i32
    %c0_i32_0 = arith.constant 0 : i32
    %c0_i32_1 = arith.constant 0 : i32
    return %c0_i32, %c0_i32_0 : i32, i32
  }
  func.func @transform_3(%arg0: i32) -> (i32, i32) {
    %c0_i32 = arith.constant 0 : i32
    %c0_i32_0 = arith.constant 0 : i32
    return %arg0, %c0_i32 : i32, i32
  }
}

</mosaic_0001>

<bundles_post_ra>
// kernel: _lambda_.1
= control target key start
LH: loop header
LB: loop body
LE: loop exit
PB: predicated region body
PF: predicated region fallthrough
CT: control target
= control target key end

     0   :  { %8 = vsyncpa [#allocation3], 0  ;;  %s160_s15 = smov [#allocation2]   ;;  %s161_s17 = smov 128   ;;  %s208_s0 = inlined_call_operand.vmem [shape: s32[8,8], index: 0, kind: input, shape index: {}]   ;;  %s209_s1 = inlined_call_operand.vmem [shape: f32[31,32], index: 1, kind: input, shape index: {}]   ;;  %s210_s2 = inlined_call_operand.hbm [shape: f32[32,128], index: 2, kind: input, shape index: {}]   ;;  %s211_s3 = inlined_call_operand.vmem [shape: f32[8,128], index: 3, kind: output, shape index: {}]  }
   0x1   :  { %s17_s14 = sshll.u32 %s210_s2, 4  ;;  %s19_s16 = sshll.u32 %s160_s15, 4  ;;  %s18_s14 = int_to_ptr.hbm [resolvable:$true] %s17_s14  ;;  %s20_s16 = int_to_ptr.vmem [resolvable:$true] %s19_s16 }
   0x2   :  { %s162_s18 = smov 8  }
   0x3   :  { %25 = dma.hbm_to_vmem [thread:$0]  %s18_s14, 512, %s20_s16, [#allocation3], %s161_s17, %s161_s17, %s162_s18  }
   0x4   :  { %158 = dma.done.wait [#allocation3], 512  }
   0x5   :  { %159 = vsyncadd [#allocation3], 4294966784  ;;  %v163_v0 = vmov 1   ;;  %v164_v1 = vmov 0   ;;  %v30_v2 = vld [vmem:[%s208_s0] sm:$0xff]  ;;  %v165_v3 = vmov 2   ;;  %v31_v11 = vlaneseq }
   0x6   :  { %130 = vset.pattern.permute.xlu0 %v163_v0  ;;  %132 = vset.pattern.permute.xlu1 %v164_v1  ;;  %v55_v4 = vld [vmem:[%s209_s1 + $0x18] sm:$0x7f]  ;;  %vm60_vm0 = vcmask 1046528   ;;  %v54_v5 = vld [vmem:[%s209_s1 + $0x10] sm:$0xff]  ;;  %v53_v6 = vld [vmem:[%s209_s1 + $0x8] sm:$0xff]  ;;  %v166_v15 = vmov 0.0  }
   0x7   :  { %34 = vperm.xlu0 %130, %v30_v2   ;;  %46 = vperm.xlu1 %132, %v30_v2   ;;  %v52_v7 = vld [vmem:[%s209_s1] sm:$0xff]  ;;  %v88_v8 = vld [vmem:[#allocation2 + $0x18] sm:$0xff]  ;;  %v87_v9 = vld [vmem:[#allocation2 + $0x10] sm:$0xff]  ;;  %v32_v12 = vand.u32 127, %v31_v11  ;;  %vm56_vm6 = vcmask 252928   ;;  %vm89_vm7 = vcmask 261120  }
   0x8   :  { %120 = vmatpush.msk.msra.mxu0 %vm60_vm0, %v55_v4  ;;  %105 = vmatpush.msra.mxu1 %v88_v8  ;;  %v86_v19 = vld [vmem:[#allocation2 + $0x8] sm:$0xff]  ;;  %v85_v20 = vld [vmem:[#allocation2] sm:$0xff] }
   0x9   :  { %vm44_vm3 = vcmp.eq.s32.totalorder %v32_v12, 29  ;;  %vm50_vm5 = vcmp.eq.s32.totalorder %v32_v12, 30 }
   0xa   :  { %77 = vmatpush.msra.mxu0 %v54_v5  ;;  %106 = vmatpush.msra.mxu1 %v87_v9 }
   0xc   :  { %78 = vmatpush.msra.mxu0 %v53_v6  ;;  %107 = vmatpush.msra.mxu1 %v86_v19 }
   0xe   :  { %79 = vmatpush.msra.mxu0 %v52_v7  ;;  %108 = vmatpush.msra.mxu1 %v85_v20 }
   0xf   :  { %131 = vset.pattern.permute.xlu0 %v165_v3 }
  0x10   :  { %38 = vperm.xlu0 %131, %v30_v2  }
  0x18   :  { %133 = vset.pattern.permute.xlu0 %v164_v1 }
  0x79   :  { %v35_v10 = vpop.permute.xlu0 %34  ;;  %v47_v14 = vpop.permute.xlu1 %46 }
  0x7a   :  { %vm36_vm1 = vcmp.eq.s32.totalorder %v32_v12, %v35_v10 }
  0x82   :  { %v39_v13 = vpop.permute.xlu0 %38 }
  0x83   :  { %vm40_vm2 = vcmp.eq.s32.totalorder %v32_v12, %v39_v13 }
  0x84   :  { %vm41_vm4 = vmor %vm36_vm1, %vm40_vm2 }
  0x85   :  { %v119_v16 = vsel %vm41_vm4, 1.0, %v166_v15 }
  0x86   :  { %v49_v17 = vsel %vm44_vm3, %v47_v14, %v119_v16 }
  0x87   :  { %v51_v18 = vsel %vm50_vm5, 1.0, %v49_v17 }
  0x88   :  { %121 = vmatmul.msk.f32.vlgmr.msra.gmra.mxu0 %vm56_vm6, %v51_v18 }
 0x105   :  { %v81_v21 = vpop.f32.mrf.mxu0 }
 0x106   :  { %v84_v22 = vmax.f32 %v81_v21, 0.0 }
 0x108   :  { %122 = vmatmul.msk.f32.vlgmr.msra.gmra.mxu1 %vm89_vm7, %v84_v22 }
 0x185   :  { %v110_v23 = vpop.f32.mrf.mxu1 }
 0x186   :  { %113 = vst [vmem:[%s211_s3] sm:$0xff] %v110_v23 }
 0x187   :  { %118 = vsyncpa [#allocation3], 1 }

</bundles_post_ra>
